<compile_context>
chip_gen: v7x
topology: tpu7x:2x2x1
jax: 0.10.0
libtpu: 0.0.40
codegen_flags: <defaults>
</compile_context>

<pallas_src>
import functools

import numpy as np
import jax
import jax.numpy as jnp
from jax import lax
from jax.experimental import pallas as pl
from jax.experimental.pallas import tpu as pltpu


# --------------------- pltpu.roll direction probe (cached) ------------------ #

_ROLL_SIGN = None


def _roll_sign():
    """Return sgn such that pltpu.roll(x, sgn*s, axis=-1) == jnp.roll(x, s, axis=-1)."""
    global _ROLL_SIGN
    if _ROLL_SIGN is None:
        def probe(x_ref, o_ref):
            o_ref[...] = pltpu.roll(x_ref[...], shift=3, axis=1)

        x = jnp.broadcast_to(jnp.arange(128, dtype=jnp.float32), (8, 128))
        r = pl.pallas_call(
            probe, out_shape=jax.ShapeDtypeStruct((8, 128), jnp.float32))(x)
        if bool(jnp.allclose(r, jnp.roll(x, 3, axis=-1))):
            _ROLL_SIGN = 1
        elif bool(jnp.allclose(r, jnp.roll(x, -3, axis=-1))):
            _ROLL_SIGN = -1
        else:
            raise RuntimeError("could not determine pltpu.roll direction")
    return _ROLL_SIGN


# ----------------------------- Pallas kernel ------------------------------- #

def _transition_kernel(cin, cout, cpack, dil, sgn,
                       x_ref, w1_ref, b1_ref, dw2_ref, bdw2_ref,
                       w2_ref, bp2_ref, dw1_ref, bdw1_ref,
                       wq_ref, bp1_ref, w3_ref, b3_ref, out_ref):
    B, F, L = x_ref.shape          # L = T * cpack, channels minor on lanes
    C = cpack
    F2 = F - 2

    def lroll(z, s):
        """jnp.roll(z, s, axis=-1) via the XLU lane rotate (direction probed)."""
        amt = (sgn * s) % z.shape[-1]
        if amt == 0:
            return z
        return pltpu.roll(z, shift=amt, axis=z.ndim - 1)

    def conv1x1(z, w_ref, n_in, n_out):
        """1x1 conv over the channel-minor packed lane axis as shifted VPU MACs.

        y[.., t*C+o] = sum_i z[.., t*C+i] * w[i, o]   with i = o - s,
        realized as sum over s of roll(z, s) * W_s where W_s is a per-lane
        weight table (zero where o-s is out of range, so cross-t and wrap-around
        contributions vanish).  Avoids tiny-K MXU matmuls entirely.
        """
        acc = None
        for j, s in enumerate(range(-(n_in - 1), n_out)):
            term = lroll(z, s) * w_ref[j]
            acc = term if acc is None else acc + term
        return acc

    x = x_ref[...]                                            # (B, F, T*C)

    # ---- f2: 1x1 Conv2d (+ folded BN1) + ReLU ----
    h = jnp.maximum(conv1x1(x, w1_ref, cin, cout) + b1_ref[0], 0.0)

    # ---- f2: depthwise Conv2d, kernel (3,1), valid, along F (sublane axis) ----
    d = (h[:, 0:F2] * dw2_ref[0] + h[:, 1:F2 + 1] * dw2_ref[1]
         + h[:, 2:F2 + 2] * dw2_ref[2]) + bdw2_ref[0]

    # ---- f2: pointwise 1x1 Conv2d (+ folded BN2) -> residual ----
    res = conv1x1(d, w2_ref, cout, cout) + bp2_ref[0]         # (B, F2, T*C)

    # ---- avg_pool2d over F + squeeze ----
    p = jnp.mean(res, axis=1)                                 # (B, T*C)

    # ---- f1: depthwise Conv1d, kernel 3, dilation dil, valid, along T ----
    # dw1/bdw1 lane tables are zero for t >= T-2*dil, so the tail stays exactly
    # 0, which implements the reference's right-pad-with-zeros for free.
    q = (p * dw1_ref[0]
         + lroll(p, -dil * C) * dw1_ref[1]
         + lroll(p, -2 * dil * C) * dw1_ref[2]) + bdw1_ref[0]

    # ---- f1: pointwise 1x1 (+ folded BN3), SiLU, final 1x1 Conv1d ----
    # TODO(synk): nn.Dropout(0.1) is treated as eval-mode identity.
    s1 = conv1x1(q, wq_ref, cout, cout) + bp1_ref[0]
    s1 = s1 * jax.nn.sigmoid(s1)                              # SiLU (EUP)
    u = conv1x1(s1, w3_ref, cout, cout) + b3_ref[0]           # (B, T*C), 0 tail

    # ---- broadcast over F, residual add, ReLU -> one dense 128-lane store ----
    out_ref[...] = jnp.maximum(res + u[:, None, :], 0.0)


# ------------------------------- wrapper ------------------------------------ #

def _fold_bn(w_oi, b, g, beta, m, v, eps=1e-5):
    """Fold eval-mode BatchNorm into a 1x1 conv (weight [O, I], bias [O])."""
    s = g / jnp.sqrt(v + eps)
    return w_oi * s[:, None], b * s + (beta - m * s)


def transition_block_forward(x_nchw, params, stride=(1, 1), dilation=(1, 1),
                             padding=(0, 0)):
    p = params
    dil = int(dilation[1])
    sgn = _roll_sign()

    # --- glue: fold eval-mode BatchNorms into the adjacent 1x1 convs ---
    w1, b1 = _fold_bn(p['conv1_w'][:, :, 0, 0], p['conv1_b'],
                      p['bn1_g'], p['bn1_b'], p['bn1_m'], p['bn1_v'])
    wp2, bp2 = _fold_bn(p['pw2_w'][:, :, 0, 0], p['pw2_b'],
                        p['bn2_g'], p['bn2_b'], p['bn2_m'], p['bn2_v'])
    wp1, bp1 = _fold_bn(p['pw1_w'][:, :, 0], p['pw1_b'],
                        p['bn3_g'], p['bn3_b'], p['bn3_m'], p['bn3_v'])
    w3, b3 = p['conv3_w'][:, :, 0], p['conv3_b']

    # --- glue: stride/padding of the first 1x1 conv ---
    x = x_nchw.astype(jnp.float32)
    if tuple(padding) != (0, 0):
        x = jnp.pad(x, ((0, 0), (0, 0),
                        (padding[0], padding[0]), (padding[1], padding[1])))
    if tuple(stride) != (1, 1):
        x = x[:, :, ::stride[0], ::stride[1]]

    B, Cin, F, T = x.shape
    Cout = w1.shape[0]
    C = max(Cin, Cout)             # packed channel count (minor on lane axis)
    L = T * C
    F2, T2 = F - 2, T - 2 * dil
    if F2 <= 0 or T2 <= 0:
        raise ValueError(f"TransitionBlock needs F > 2 and T > 2*dilation, "
                         f"got F={F}, T={T}, dilation={dil}")

    # --- glue: NCHW -> packed (B, F, T*C), channels minor on lanes ---
    # TODO(synk): for a chain of BC-ResNet blocks, keep this packed layout
    # end-to-end instead of converting to/from NCHW around every block.
    xt = jnp.transpose(x, (0, 2, 3, 1))                       # (B, F, T, Cin)
    if Cin < C:
        xt = jnp.pad(xt, ((0, 0), (0, 0), (0, 0), (0, C - Cin)))
    x_packed = xt.reshape(B, F, L)

    # --- glue: per-lane weight tables -------------------------------------- #
    def lane_vec(v, valid_t=None):
        """(c,) per-channel vector -> (1, L) per-lane vector (zero for padded
        channels and, optionally, zero for t >= valid_t)."""
        full = jnp.zeros((C,), jnp.float32).at[:v.shape[0]].set(
            v.astype(jnp.float32))
        lane = jnp.tile(full, T)
        if valid_t is not None:
            lane = jnp.where(jnp.arange(L) < valid_t * C, lane, 0.0)
        return lane.reshape(1, L)

    def shift_weights(w_oi):
        """(O, I) 1x1-conv weight -> (I+O-1, L) per-lane tables for the
        shifted-MAC formulation; row j corresponds to shift s = j - (I-1)."""
        O, I = w_oi.shape
        o = np.arange(C)
        rows = []
        for s in range(-(I - 1), O):
            i = o - s
            valid = (o < O) & (i >= 0) & (i < I)
            col = jnp.where(jnp.asarray(valid),
                            w_oi[np.clip(o, 0, O - 1), np.clip(i, 0, I - 1)],
                            0.0)
            rows.append(jnp.tile(col.astype(jnp.float32), T))
        return jnp.stack(rows, axis=0)

    W1, Wp2, Wp1, W3m = (shift_weights(w1), shift_weights(wp2),
                         shift_weights(wp1), shift_weights(w3))
    b1_l, bp2_l = lane_vec(b1), lane_vec(bp2)
    dw2_l = jnp.concatenate(
        [lane_vec(p['dw2_w'][:, 0, k, 0]) for k in range(3)], axis=0)
    bdw2_l = lane_vec(p['dw2_b'])
    dw1_l = jnp.concatenate(
        [lane_vec(p['dw1_w'][:, 0, k], T2) for k in range(3)], axis=0)
    bdw1_l = lane_vec(p['dw1_b'], T2)
    bp1_l, b3_l = lane_vec(bp1, T2), lane_vec(b3, T2)

    kernel = functools.partial(_transition_kernel, Cin, Cout, C, dil, sgn)

    # Single fused step: whole (tiny) problem resident in VMEM, no grid.
    out_packed = pl.pallas_call(
        kernel,
        out_shape=jax.ShapeDtypeStruct((B, F2, L), jnp.float32),
    )(x_packed, W1, b1_l, dw2_l, bdw2_l, Wp2, bp2_l,
      dw1_l, bdw1_l, Wp1, bp1_l, W3m, b3_l)

    # --- glue: packed (B, F2, T, C) -> NCHW (B, Cout, F-2, T) ---
    out = out_packed.reshape(B, F2, T, C)[..., :Cout]
    return jnp.transpose(out, (0, 3, 1, 2))


# ------------------------ deterministic parameters -------------------------- #

def init_params(key, cin, cout):
    ks = iter(jax.random.split(key, 32))

    def w(shape, scale=0.1):
        return scale * jax.random.normal(next(ks), shape, jnp.float32)

    return dict(
        conv1_w=w((cout, cin, 1, 1)), conv1_b=w((cout,), 0.05),
        bn1_g=1.0 + w((cout,)), bn1_b=w((cout,), 0.05),
        bn1_m=w((cout,), 0.05), bn1_v=1.0 + jnp.abs(w((cout,))),
        dw2_w=w((cout, 1, 3, 1)), dw2_b=w((cout,), 0.05),
        pw2_w=w((cout, cout, 1, 1)), pw2_b=w((cout,), 0.05),
        bn2_g=1.0 + w((cout,)), bn2_b=w((cout,), 0.05),
        bn2_m=w((cout,), 0.05), bn2_v=1.0 + jnp.abs(w((cout,))),
        dw1_w=w((cout, 1, 3)), dw1_b=w((cout,), 0.05),
        pw1_w=w((cout, cout, 1)), pw1_b=w((cout,), 0.05),
        bn3_g=1.0 + w((cout,)), bn3_b=w((cout,), 0.05),
        bn3_m=w((cout,), 0.05), bn3_v=1.0 + jnp.abs(w((cout,))),
        conv3_w=w((cout, cout, 1)), conv3_b=w((cout,), 0.05),
    )


# --------------------------- plain-JAX reference ---------------------------- #

def _bn_eval(x, g, b, m, v, eps=1e-5):
    shp = (1, -1) + (1,) * (x.ndim - 2)
    return (x - m.reshape(shp)) / jnp.sqrt(v.reshape(shp) + eps) * g.reshape(shp) \
        + b.reshape(shp)


def _conv2d(x, w, b, stride=(1, 1), padding=(0, 0), dilation=(1, 1), groups=1):
    y = lax.conv_general_dilated(
        x, w, window_strides=stride,
        padding=[(padding[0], padding[0]), (padding[1], padding[1])],
        rhs_dilation=dilation, dimension_numbers=('NCHW', 'OIHW', 'NCHW'),
        feature_group_count=groups)
    return y + b.reshape(1, -1, 1, 1)


def _conv1d(x, w, b, dilation=1, groups=1):
    y = lax.conv_general_dilated(
        x, w, window_strides=(1,), padding=[(0, 0)],
        rhs_dilation=(dilation,), dimension_numbers=('NCH', 'OIH', 'NCH'),
        feature_group_count=groups)
    return y + b.reshape(1, -1, 1)


def reference_forward(x, p, stride=(1, 1), dilation=(1, 1), padding=(0, 0)):
    dil = int(dilation[1])
    h = _conv2d(x, p['conv1_w'], p['conv1_b'], stride, padding)
    h = _bn_eval(h, p['bn1_g'], p['bn1_b'], p['bn1_m'], p['bn1_v'])
    h = jnp.maximum(h, 0.0)
    h = _conv2d(h, p['dw2_w'], p['dw2_b'], groups=h.shape[1])
    h = _conv2d(h, p['pw2_w'], p['pw2_b'])
    h = _bn_eval(h, p['bn2_g'], p['bn2_b'], p['bn2_m'], p['bn2_v'])
    res = h
    B, C, F, T = h.shape
    z = jnp.mean(h, axis=2)                           # avg_pool2d((F,1)) + squeeze
    z = _conv1d(z, p['dw1_w'], p['dw1_b'], dilation=dil, groups=C)
    z = _conv1d(z, p['pw1_w'], p['pw1_b'], dilation=dil)
    z = _bn_eval(z, p['bn3_g'], p['bn3_b'], p['bn3_m'], p['bn3_v'])
    z = z * jax.nn.sigmoid(z)
    z = _conv1d(z, p['conv3_w'], p['conv3_b'])        # dropout: eval identity
    z = z[:, :, None, :]
    z = jnp.broadcast_to(z, (B, C, F, z.shape[-1]))
    if z.shape[-1] != T:
        z = jnp.pad(z, ((0, 0), (0, 0), (0, 0), (0, T - z.shape[-1])))
    return jnp.maximum(z + res, 0.0)


# ---------------------------------- main ------------------------------------ #

if __name__ == "__main__":
    key = jax.random.PRNGKey(0)
    kx, kp = jax.random.split(key)
    B, Cin, Cout, F, T = 2, 4, 8, 16, 16
    x = jax.random.normal(kx, (B, Cin, F, T), jnp.float32)   # PyTorch NCHW
    params = init_params(kp, Cin, Cout)

    out = transition_block_forward(x, params)
    out = jax.block_until_ready(out)

    ref = reference_forward(x, params)
    assert out.shape == ref.shape, (out.shape, ref.shape)
    max_err = float(jnp.max(jnp.abs(out - ref)))
    if not jnp.allclose(out, ref, rtol=1e-2, atol=1e-3):
        raise AssertionError(f"mismatch vs reference, max abs err = {max_err}")
    print("KERNEL_OK")
</pallas_src>

<mosaic_0001>
module attributes {stable_mosaic.version = 11 : i64} {
  func.func @probe(%arg0: memref<8x128xf32, #tpu.memory_space<vmem>>, %arg1: memref<8x128xf32, #tpu.memory_space<vmem>>) attributes {dimension_semantics = [], scalar_prefetch = 0 : i64, scratch_operands = 0 : i64, tpu.core_type = #tpu.core_type<tc>} {
    %c0 = arith.constant 0 : index
    %c0_0 = arith.constant 0 : index
    %0 = vector.load %arg0[%c0, %c0_0] : memref<8x128xf32, #tpu.memory_space<vmem>>, vector<8x128xf32>
    %c3_i32 = arith.constant 3 : i32
    %1 = tpu.dynamic_rotate %0 by %c3_i32 dim 1 : vector<8x128xf32>, i32 -> vector<8x128xf32>
    %c0_1 = arith.constant 0 : index
    %c0_2 = arith.constant 0 : index
    %2 = vector.load %arg1[%c0_1, %c0_2] : memref<8x128xf32, #tpu.memory_space<vmem>>, vector<8x128xf32>
    tpu.vector_store %arg1[%c0_1, %c0_2], %1 {strides = array<i32>} : memref<8x128xf32, #tpu.memory_space<vmem>>, vector<8x128xf32>,
    return
  }
}

</mosaic_0001>

<bundles_post_ra>
// kernel: tpu_custom_call.1
= control target key start
LH: loop header
LB: loop body
LE: loop exit
PB: predicated region body
PF: predicated region fallthrough
CT: control target
= control target key end

     0   :  { %6 = vsyncpa [#allocation3], 0  ;;  %s128_s0 = inlined_call_operand.hbm [shape: f32[8,128], index: 0, kind: input, shape index: {}]   ;;  %s129_s1 = inlined_call_operand.hbm [shape: f32[8,128], index: 1, kind: output, shape index: {}]  }
   0x1   :  { %7 = vsyncpa [#allocation4], 0  ;;  %s91_s6 = smov [#allocation2]   ;;  %s43_s10 = scalar_lea.hbm %s128_s0, 128 }
   0x2   :  { %s14_s7 = sshll.u32 %s91_s6, 4  ;;  %p44_p0 = scmp.ne.s32.totalorder %s128_s0, %s43_s10  ;;  %s15_s7 = int_to_ptr.vmem [resolvable:$true] %s14_s7 }
   0x3   :  { %p47_p1 = scmp.lt.u32.totalorder %s43_s10, %s128_s0 }
   0x5   :  { %p49_p2 = pnand %p47_p1, %p44_p0 }
   0x7   :  { %52 = shalt.err (!%p49_p2)
}
   0x8   :  { %s53_s15 = scalar_lea.vmem %s15_s7, 128  ;;  %p58_p4 = scmp.lt.s32.totalorder %s15_s7, %s15_s7 }
   0x9   :  { %p54_p3 = scmp.ne.s32.totalorder %s15_s7, %s53_s15  ;;  %p59_p5 = scmp.lt.s32.totalorder %s53_s15, %s53_s15 }
   0xb   :  { %p60_p6 = por %p59_p5, %p58_p4 }
   0xd   :  { %p61_p7 = pnand %p60_p6, %p54_p3 }
   0xf   :  { %64 = shalt.err (!%p61_p7)
}
  0x10   :  { %17 = dma.hbm_to_vmem [thread:$0]  %s128_s0, 128, %s15_s7, [#allocation3]  }
  0x11   :  { %87 = dma.done.wait [#allocation3], 128  }
  0x12   :  { %88 = vsyncadd [#allocation3], 4294967168  ;;  %v21_v0 = vld [vmem:[#allocation2] sm:$0xff]  ;;  %s92_s18 = smov 3   ;;  %s93_s19 = smov [#allocation5]  }
  0x13   :  { %22 = vrot.lane.b32.xlu0 %v21_v0, %s92_s18  ;;  %s31_s20 = sshll.u32 %s93_s19, 4  ;;  %s32_s20 = int_to_ptr.vmem [resolvable:$true] %s31_s20 }
  0x14   :  { %s65_s21 = scalar_lea.vmem %s32_s20, 128  ;;  %p70_p9 = scmp.lt.s32.totalorder %s32_s20, %s32_s20 }
  0x15   :  { %p66_p8 = scmp.ne.s32.totalorder %s32_s20, %s65_s21  ;;  %p71_p10 = scmp.lt.s32.totalorder %s65_s21, %s65_s21 }
  0x17   :  { %p72_p11 = por %p71_p10, %p70_p9 }
  0x19   :  { %p73_p12 = pnand %p72_p11, %p66_p8 }
  0x85   :  { %v23_v1 = vpop.permute.xlu0 %22 }
  0x86   :  { %24 = vst [vmem:[#allocation5] sm:$0xff] %v23_v1 }
  0x87   :  { %76 = shalt.err (!%p73_p12)
}
  0x88   :  { %s77_s0 = scalar_lea.hbm %s129_s1, 128 }
  0x89   :  { %p78_p13 = scmp.ne.s32.totalorder %s129_s1, %s77_s0  ;;  %p81_p0 = scmp.lt.u32.totalorder %s77_s0, %s129_s1 }
  0x8b   :  { %p83_p1 = pnand %p81_p0, %p78_p13 }
  0x8d   :  { %86 = shalt.err (!%p83_p1)
}
  0x8e   :  { %34 = dma.vmem_to_hbm [thread:$0]  %s32_s20, 128, %s129_s1, [#allocation4]  }
  0x8f   :  { %89 = dma.done.wait [#allocation4], 128  }
  0x90   :  { %90 = vsyncadd [#allocation4], 4294967168 }
  0x91   :  { %38 = vsyncpa [#allocation3], 1 }
  0x92   :  { %39 = vsyncpa [#allocation4], 1 }

</bundles_post_ra>
